<compile_context>
chip_gen: v7x
topology: tpu7x:2x2x1
jax: 0.10.0
libtpu: 0.0.40
codegen_flags: <defaults>
</compile_context>

<pallas_src>
import functools

import numpy as np
import jax
import jax.numpy as jnp
from jax.experimental import pallas as pl
from jax.experimental.pallas import tpu as pltpu


def _round_up(x, m):
    return (x + m - 1) // m * m


def _tpu_tuning():
    """Perf-only heuristics: (single-TensorCore-per-chip?, vmem_limit_bytes)."""
    try:
        kind = jax.devices()[0].device_kind.lower()
        multi_tc = "v7" in kind
    except Exception:
        multi_tc = True                       # conservative defaults
    if multi_tc:
        return False, 40 * 1024 * 1024        # v7x: 64 MiB physical per TC
    return True, 64 * 1024 * 1024             # v5e/v6e: 128 MiB physical


_TPU_TUNING = _tpu_tuning()


def _make_conv_kernel(offsets, Ppad, inv_count, use_bias, use_norm, act):
    """Kernel: conv as <=len(offsets) grouped MXU dots + (norm) + activation."""

    def kernel(*refs):
        x_ref, w_ref = refs[0], refs[1]
        i = 2
        b_ref = m_ref = None
        if use_bias:
            b_ref = refs[i]; i += 1
        if use_norm:
            m_ref = refs[i]; i += 1
        o_ref = refs[i]

        # Grouped conv taps: (TCo, G*Cin_p) x (G*Cin_p, Ppad) -> f32, one dot
        # per distinct lane offset.  Two independent accumulation chains.
        part = [None, None]
        for idx, off in enumerate(offsets):
            patch = x_ref[0, :, off:off + Ppad]          # (G*Cin_p, Ppad) bf16
            d = jnp.dot(w_ref[idx], patch, preferred_element_type=jnp.float32)
            c = idx & 1
            part[c] = d if part[c] is None else part[c] + d
        acc = part[0] if part[1] is None else part[0] + part[1]

        if use_bias:
            acc = acc + b_ref[...]                       # (TCo,1) broadcast over lanes

        if use_norm:
            # InstanceNorm2d(affine=False, eps=1e-5, biased var) over valid
            # spatial positions only; s1/s2 computed in a single sweep.
            m = m_ref[...]                               # (1, Ppad) f32 0/1
            am = acc * m
            s1 = jnp.sum(am, axis=1, keepdims=True)
            s2 = jnp.sum(am * acc, axis=1, keepdims=True)
            mean = s1 * inv_count
            var = jnp.maximum(s2 * inv_count - mean * mean, 0.0)
            y = (acc - mean) * jax.lax.rsqrt(var + 1e-5)
        else:
            y = acc

        if act == "leaky":
            y = jnp.maximum(y, 0.2 * y)                  # LeakyReLU(0.2)
        elif act == "sigmoid":
            y = pl.reciprocal(1.0 + jnp.exp(-y), approx=True)
        o_ref[0] = y.astype(o_ref.dtype)

    return kernel


def conv_layer(x, weight, bias, *, stride, use_norm, activation,
               out_dtype=jnp.float32):
    """Fused Conv2d(k, stride, padding=1, reflect) [+bias] [+InstanceNorm2d] [+act].

    x      : (N, Cin, H, W)    f32 or bf16, NCHW (PyTorch layout)
    weight : (Cout, Cin, k, k) f32, OIHW (PyTorch layout)
    bias   : (Cout,)           f32 (ignored when use_norm: InstanceNorm cancels it)
    returns: (N, Cout, Ho, Wo) out_dtype, NCHW
    """
    N, Cin, H, W = x.shape
    Cout, Cin_w, k, k2 = weight.shape
    assert Cin_w == Cin and k == k2
    s = stride
    Hp, Wp = H + 2, W + 2
    assert Hp % s == 0 and Wp % s == 0, "H+2 and W+2 must be divisible by the stride"
    Ho, Wo = (Hp - k) // s + 1, (Wp - k) // s + 1
    Hq, Wq = Hp // s, Wp // s                      # per-parity-plane spatial dims
    G = s * s
    noh = (k - 1) // s + 1                         # offsets per axis
    NOFF = noh * noh
    Ppad = _round_up(Ho * Wq, 128)                 # flattened output positions (lanes)
    o_max = ((k - 1) // s) * Wq + (k - 1) // s
    Lpad = _round_up(o_max + Ppad, 128)            # flattened input positions  (lanes)
    Cin_p = _round_up(Cin, 8)
    Cout_p = _round_up(Cout, 8)
    GK = G * Cin_p

    single_tc, vmem_limit = _TPU_TUNING
    if single_tc and Cout_p % 256 == 0:
        TCo = 256                                  # fewer grid steps on 1-TC chips
    elif Cout_p % 128 == 0:
        TCo = 128                                  # keep 2-TC parallelism on v7x
    else:
        TCo = Cout_p

    # ---- input repack: bf16, reflect pad, stride space-to-depth, flatten ----
    xb = x.astype(jnp.bfloat16)
    if Cin_p > Cin:
        xb = jnp.pad(xb, ((0, 0), (0, Cin_p - Cin), (0, 0), (0, 0)))
    x_p = jnp.pad(xb, ((0, 0), (0, 0), (1, 1), (1, 1)), mode="reflect")
    planes = [x_p[:, :, ph::s, pw::s].reshape(N, Cin_p, Hq * Wq)
              for ph in range(s) for pw in range(s)]
    xs = jnp.concatenate(planes, axis=1) if G > 1 else planes[0]   # (N, G*Cin_p, Hq*Wq)
    xs = jnp.pad(xs, ((0, 0), (0, 0), (0, Lpad - Hq * Wq)))

    # ---- weights: OIHW -> (NOFF, Cout_p, G*Cin_p), grouped by lane offset ----
    w_p = jnp.pad(weight, ((0, Cout_p - Cout), (0, Cin_p - Cin), (0, 0), (0, 0)))
    zero_tap = jnp.zeros((Cout_p, Cin_p), weight.dtype)
    groups = []
    for oh in range(noh):
        for ow in range(noh):
            taps = []
            for ph in range(s):
                for pw in range(s):
                    kh, kw = oh * s + ph, ow * s + pw
                    taps.append(w_p[:, :, kh, kw] if (kh < k and kw < k) else zero_tap)
            groups.append(jnp.concatenate(taps, axis=1) if G > 1 else taps[0])
    wg = jnp.stack(groups, axis=0).astype(jnp.bfloat16)            # (NOFF, Cout_p, GK)
    offsets = tuple(oh * Wq + ow for oh in range(noh) for ow in range(noh))

    use_bias = not use_norm                       # bias is a no-op under InstanceNorm

    args = [xs, wg]
    in_specs = [
        pl.BlockSpec((1, GK, Lpad), lambda n, j: (n, 0, 0)),
        pl.BlockSpec((NOFF, TCo, GK), lambda n, j: (0, j, 0)),
    ]
    if use_bias:
        b = jnp.pad(bias, (0, Cout_p - Cout)).astype(jnp.float32).reshape(Cout_p, 1)
        args.append(b)
        in_specs.append(pl.BlockSpec((TCo, 1), lambda n, j: (j, 0)))
    if use_norm:
        cols = np.arange(Ppad)
        valid = ((cols % Wq) < Wo) & (cols < Ho * Wq)
        mask = jnp.asarray(valid.astype(np.float32)).reshape(1, Ppad)
        args.append(mask)
        in_specs.append(pl.BlockSpec((1, Ppad), lambda n, j: (0, 0)))

    kernel = _make_conv_kernel(offsets, Ppad, 1.0 / float(Ho * Wo),
                               use_bias, use_norm, activation)

    out = pl.pallas_call(
        kernel,
        out_shape=jax.ShapeDtypeStruct((N, Cout_p, Ppad), out_dtype),
        grid_spec=pltpu.PrefetchScalarGridSpec(
            num_scalar_prefetch=0,
            grid=(N, Cout_p // TCo),
            in_specs=in_specs,
            out_specs=pl.BlockSpec((1, TCo, Ppad), lambda n, j: (n, j, 0)),
        ),
        compiler_params=pltpu.CompilerParams(
            dimension_semantics=("parallel", "parallel"),
            vmem_limit_bytes=vmem_limit,
        ),
    )(*args)

    # (N, Cout_p, Ppad) -> NCHW (N, Cout, Ho, Wo): drop channel padding + garbage cols.
    out = out[:, :Cout, :Ho * Wq].reshape(N, Cout, Ho, Wq)[:, :, :, :Wo]
    return out


@functools.partial(jax.jit, static_argnames=("stride",))
def block_forward(x, weight, bias, stride):
    """Discriminator Block: Conv3x3(reflect, p=1) + InstanceNorm2d + LeakyReLU(0.2)."""
    return conv_layer(x, weight, bias, stride=stride, use_norm=True,
                      activation="leaky", out_dtype=jnp.float32)


@functools.partial(jax.jit, static_argnames=("cfg",))
def discriminator_forward(x, params, cfg):
    """Full Discriminator: initial conv + leaky, Blocks, final conv, sigmoid.

    Intermediate activations are stored bf16 (next layer consumes bf16 anyway);
    the final sigmoid output is f32.
    """
    for (w, b), (_k, s, norm, act) in zip(params, cfg):
        out_dtype = jnp.bfloat16 if act == "leaky" else jnp.float32
        x = conv_layer(x, w, b, stride=s, use_norm=norm, activation=act,
                       out_dtype=out_dtype)
    return x


def make_discriminator_params(key, in_channels=3, features=(64, 128, 256, 512)):
    layer_defs = [(features[0], in_channels, 4, 2, False, "leaky")]      # initial
    prev = features[0]
    for f in features[1:]:
        layer_defs.append((f, prev, 3, 1 if f == features[-1] else 2, True, "leaky"))
        prev = f
    layer_defs.append((1, prev, 4, 1, False, "sigmoid"))                 # final conv + sigmoid

    params = []
    for (co, ci, k, _s, _norm, _act) in layer_defs:
        key, kw_key, kb_key = jax.random.split(key, 3)
        params.append((jax.random.normal(kw_key, (co, ci, k, k), jnp.float32) * 0.05,
                       jax.random.normal(kb_key, (co,), jnp.float32) * 0.05))
    cfg = tuple((k, s, norm, act) for (_co, _ci, k, s, norm, act) in layer_defs)
    return params, cfg


# ----------------------------- references ----------------------------------

def _block_reference(x, weight, bias, stride):
    """Pure-JAX f32 reference for one Block (reflect conv + InstanceNorm + LeakyReLU)."""
    x_p = jnp.pad(x, ((0, 0), (0, 0), (1, 1), (1, 1)), mode="reflect")
    y = jax.lax.conv_general_dilated(
        x_p, weight, window_strides=(stride, stride), padding="VALID",
        dimension_numbers=("NCHW", "OIHW", "NCHW"),
        precision=jax.lax.Precision.HIGHEST)
    y = y + bias.reshape(1, -1, 1, 1)
    mean = jnp.mean(y, axis=(2, 3), keepdims=True)
    var = jnp.mean((y - mean) ** 2, axis=(2, 3), keepdims=True)
    y = (y - mean) * jax.lax.rsqrt(var + 1e-5)
    return jnp.where(y >= 0, y, 0.2 * y)


def _layer_reference(x, weight, bias, stride, use_norm, activation):
    """Pure-JAX reference for one fused layer, mirroring the kernel's bf16 operands."""
    xb = x.astype(jnp.bfloat16)
    x_p = jnp.pad(xb, ((0, 0), (0, 0), (1, 1), (1, 1)), mode="reflect")
    y = jax.lax.conv_general_dilated(
        x_p, weight.astype(jnp.bfloat16), window_strides=(stride, stride),
        padding="VALID", dimension_numbers=("NCHW", "OIHW", "NCHW"),
        preferred_element_type=jnp.float32)
    if use_norm:
        mean = jnp.mean(y, axis=(2, 3), keepdims=True)
        var = jnp.mean((y - mean) ** 2, axis=(2, 3), keepdims=True)
        y = (y - mean) * jax.lax.rsqrt(var + 1e-5)
    else:
        y = y + bias.reshape(1, -1, 1, 1)
    if activation == "leaky":
        y = jnp.where(y >= 0, y, 0.2 * y)
    elif activation == "sigmoid":
        y = jax.nn.sigmoid(y)
    return y


def _discriminator_reference(x, params, cfg):
    for (w, b), (_k, s, norm, act) in zip(params, cfg):
        y = _layer_reference(x, w, b, s, norm, act)
        x = y.astype(jnp.bfloat16) if act == "leaky" else y
    return x


if __name__ == "__main__":
    root = jax.random.PRNGKey(0)
    kx, kw_key, kb_key, kp, kd = jax.random.split(root, 5)

    # 1) One Block (the hot path) checked against a pure-JAX f32 reference.
    N, Cin, Cout, H, W, stride = 2, 4, 8, 16, 16, 2
    x = jax.random.normal(kx, (N, Cin, H, W), jnp.float32)
    wts = jax.random.normal(kw_key, (Cout, Cin, 3, 3), jnp.float32) * 0.1
    bia = jax.random.normal(kb_key, (Cout,), jnp.float32) * 0.1
    y = jax.block_until_ready(block_forward(x, wts, bia, stride=stride))
    assert y.shape == (N, Cout, H // stride, W // stride), y.shape
    y_ref = _block_reference(x, wts, bia, stride)
    err = float(jnp.max(jnp.abs(y - y_ref)))
    assert err < 5e-2, f"block mismatch vs reference: {err}"

    # 2) Full Discriminator forward (initial conv, 3 Blocks, final conv, sigmoid)
    #    checked against a bf16-matched full-network reference.
    params, cfg = make_discriminator_params(kp, in_channels=3, features=(64, 128, 256, 512))
    xd = jax.random.normal(kd, (2, 3, 64, 64), jnp.float32)
    out = jax.block_until_ready(discriminator_forward(xd, params, cfg=cfg))
    assert out.shape == (2, 1, 7, 7), out.shape
    out_ref = _discriminator_reference(xd, params, cfg)
    err = float(jnp.max(jnp.abs(out - out_ref)))
    assert err < 5e-2, f"discriminator mismatch vs reference: {err}"
    assert bool(jnp.all((out >= 0.0) & (out <= 1.0)))

    print("KERNEL_OK")
</pallas_src>

<mosaic_0001>
module attributes {stable_mosaic.version = 11 : i64} {
  func.func @kernel(%arg0: i32, %arg1: i32, %arg2: memref<1x32x256xbf16, #tpu.memory_space<vmem>>, %arg3: memref<4x8x32xbf16, #tpu.memory_space<vmem>>, %arg4: memref<1x128xf32, #tpu.memory_space<vmem>>, %arg5: memref<1x8x128xf32, #tpu.memory_space<vmem>>) attributes {dimension_semantics = [#tpu.dimension_semantics<parallel>, #tpu.dimension_semantics<parallel>], iteration_bounds = array<i64: 2, 1>, scalar_prefetch = 0 : i64, scratch_operands = 0 : i64, tpu.core_type = #tpu.core_type<tc>, window_params = [{transform_indices = @transform_0, window_bounds = array<i64: 1, 32, 256>}, {transform_indices = @transform_1, window_bounds = array<i64: 4, 8, 32>}, {pipeline_mode = #tpu.pipeline_mode<synchronous>, transform_indices = @transform_2, window_bounds = array<i64: 1, 128>}, {transform_indices = @transform_3, window_bounds = array<i64: 1, 8, 128>}]} {
    %c0 = arith.constant 0 : index
    %c0_0 = arith.constant 0 : index
    %c0_1 = arith.constant 0 : index
    %0 = vector.load %arg2[%c0, %c0_0, %c0_1] : memref<1x32x256xbf16, #tpu.memory_space<vmem>>, vector<1x32x128xbf16>
    %1 = vector.shape_cast %0 : vector<1x32x128xbf16> to vector<32x128xbf16>
    %c0_2 = arith.constant 0 : index
    %c0_3 = arith.constant 0 : index
    %c0_4 = arith.constant 0 : index
    %2 = vector.load %arg3[%c0_2, %c0_3, %c0_4] : memref<4x8x32xbf16, #tpu.memory_space<vmem>>, vector<1x8x32xbf16>
    %3 = vector.shape_cast %2 : vector<1x8x32xbf16> to vector<8x32xbf16>
    %cst = arith.constant dense<0.000000e+00> : vector<8x128xf32>
    %4 = tpu.matmul %3, %1, %cst {dimension_numbers = #tpu.dot_dimension_numbers<[1], [0], [0], [1], [0, 0, 1, 1], [], []>} : vector<8x32xbf16>, vector<32x128xbf16>, vector<8x128xf32> -> vector<8x128xf32>
    %c0_5 = arith.constant 0 : index
    %c0_6 = arith.constant 0 : index
    %c1 = arith.constant 1 : index
    %5 = vector.load %arg2[%c0_5, %c0_6, %c1] : memref<1x32x256xbf16, #tpu.memory_space<vmem>>, vector<1x32x128xbf16>
    %6 = vector.shape_cast %5 : vector<1x32x128xbf16> to vector<32x128xbf16>
    %c1_7 = arith.constant 1 : index
    %c0_8 = arith.constant 0 : index
    %c0_9 = arith.constant 0 : index
    %7 = vector.load %arg3[%c1_7, %c0_8, %c0_9] : memref<4x8x32xbf16, #tpu.memory_space<vmem>>, vector<1x8x32xbf16>
    %8 = vector.shape_cast %7 : vector<1x8x32xbf16> to vector<8x32xbf16>
    %cst_10 = arith.constant dense<0.000000e+00> : vector<8x128xf32>
    %9 = tpu.matmul %8, %6, %cst_10 {dimension_numbers = #tpu.dot_dimension_numbers<[1], [0], [0], [1], [0, 0, 1, 1], [], []>} : vector<8x32xbf16>, vector<32x128xbf16>, vector<8x128xf32> -> vector<8x128xf32>
    %c0_11 = arith.constant 0 : index
    %c0_12 = arith.constant 0 : index
    %c9 = arith.constant 9 : index
    %10 = vector.load %arg2[%c0_11, %c0_12, %c9] : memref<1x32x256xbf16, #tpu.memory_space<vmem>>, vector<1x32x128xbf16>
    %11 = vector.shape_cast %10 : vector<1x32x128xbf16> to vector<32x128xbf16>
    %c2 = arith.constant 2 : index
    %c0_13 = arith.constant 0 : index
    %c0_14 = arith.constant 0 : index
    %12 = vector.load %arg3[%c2, %c0_13, %c0_14] : memref<4x8x32xbf16, #tpu.memory_space<vmem>>, vector<1x8x32xbf16>
    %13 = vector.shape_cast %12 : vector<1x8x32xbf16> to vector<8x32xbf16>
    %cst_15 = arith.constant dense<0.000000e+00> : vector<8x128xf32>
    %14 = tpu.matmul %13, %11, %cst_15 {dimension_numbers = #tpu.dot_dimension_numbers<[1], [0], [0], [1], [0, 0, 1, 1], [], []>} : vector<8x32xbf16>, vector<32x128xbf16>, vector<8x128xf32> -> vector<8x128xf32>
    %15 = arith.addf %4, %14 : vector<8x128xf32>
    %c0_16 = arith.constant 0 : index
    %c0_17 = arith.constant 0 : index
    %c10 = arith.constant 10 : index
    %16 = vector.load %arg2[%c0_16, %c0_17, %c10] : memref<1x32x256xbf16, #tpu.memory_space<vmem>>, vector<1x32x128xbf16>
    %17 = vector.shape_cast %16 : vector<1x32x128xbf16> to vector<32x128xbf16>
    %c3 = arith.constant 3 : index
    %c0_18 = arith.constant 0 : index
    %c0_19 = arith.constant 0 : index
    %18 = vector.load %arg3[%c3, %c0_18, %c0_19] : memref<4x8x32xbf16, #tpu.memory_space<vmem>>, vector<1x8x32xbf16>
    %19 = vector.shape_cast %18 : vector<1x8x32xbf16> to vector<8x32xbf16>
    %cst_20 = arith.constant dense<0.000000e+00> : vector<8x128xf32>
    %20 = tpu.matmul %19, %17, %cst_20 {dimension_numbers = #tpu.dot_dimension_numbers<[1], [0], [0], [1], [0, 0, 1, 1], [], []>} : vector<8x32xbf16>, vector<32x128xbf16>, vector<8x128xf32> -> vector<8x128xf32>
    %21 = arith.addf %9, %20 : vector<8x128xf32>
    %22 = arith.addf %15, %21 : vector<8x128xf32>
    %c0_21 = arith.constant 0 : index
    %c0_22 = arith.constant 0 : index
    %23 = vector.load %arg4[%c0_21, %c0_22] : memref<1x128xf32, #tpu.memory_space<vmem>>, vector<1x128xf32>
    %24 = vector.broadcast %23 : vector<1x128xf32> to vector<8x128xf32>
    %25 = arith.mulf %22, %24 : vector<8x128xf32>
    %cst_23 = arith.constant dense<0.000000e+00> : vector<8xf32>
    %26 = vector.multi_reduction <add>, %25, %cst_23 [1] : vector<8x128xf32> to vector<8xf32>
    %27 = vector.shape_cast %26 : vector<8xf32> to vector<8x1xf32>
    %28 = arith.mulf %25, %22 : vector<8x128xf32>
    %cst_24 = arith.constant dense<0.000000e+00> : vector<8xf32>
    %29 = vector.multi_reduction <add>, %28, %cst_24 [1] : vector<8x128xf32> to vector<8xf32>
    %30 = vector.shape_cast %29 : vector<8xf32> to vector<8x1xf32>
    %cst_25 = arith.constant 1.562500e-02 : f32
    %31 = vector.broadcast %cst_25 : f32 to vector<8x1xf32>
    %32 = arith.mulf %27, %31 : vector<8x1xf32>
    %cst_26 = arith.constant 1.562500e-02 : f32
    %33 = vector.broadcast %cst_26 : f32 to vector<8x1xf32>
    %34 = arith.mulf %30, %33 : vector<8x1xf32>
    %35 = arith.mulf %32, %32 : vector<8x1xf32>
    %36 = arith.subf %34, %35 : vector<8x1xf32>
    %cst_27 = arith.constant 0.000000e+00 : f32
    %37 = vector.broadcast %cst_27 : f32 to vector<8x1xf32>
    %38 = arith.maximumf %36, %37 : vector<8x1xf32>
    %39 = vector.broadcast %32 : vector<8x1xf32> to vector<8x128xf32>
    %40 = arith.subf %22, %39 : vector<8x128xf32>
    %cst_28 = arith.constant 9.99999974E-6 : f32
    %41 = vector.broadcast %cst_28 : f32 to vector<8x1xf32>
    %42 = arith.addf %38, %41 : vector<8x1xf32>
    %43 = math.rsqrt %42 : vector<8x1xf32>
    %44 = vector.broadcast %43 : vector<8x1xf32> to vector<8x128xf32>
    %45 = arith.mulf %40, %44 : vector<8x128xf32>
    %cst_29 = arith.constant 2.000000e-01 : f32
    %46 = vector.broadcast %cst_29 : f32 to vector<8x128xf32>
    %47 = arith.mulf %46, %45 : vector<8x128xf32>
    %48 = arith.maximumf %45, %47 : vector<8x128xf32>
    %c0_30 = arith.constant 0 : index
    %c0_31 = arith.constant 0 : index
    %c0_32 = arith.constant 0 : index
    %49 = vector.load %arg5[%c0_30, %c0_31, %c0_32] : memref<1x8x128xf32, #tpu.memory_space<vmem>>, vector<1x8x128xf32>
    %50 = vector.shape_cast %49 : vector<1x8x128xf32> to vector<8x128xf32>
    %51 = vector.shape_cast %48 : vector<8x128xf32> to vector<1x8x128xf32>
    tpu.vector_store %arg5[%c0_30, %c0_31, %c0_32], %51 {strides = array<i32>} : memref<1x8x128xf32, #tpu.memory_space<vmem>>, vector<1x8x128xf32>,
    return
  }
  func.func @transform_0(%arg0: i32, %arg1: i32) -> (i32, i32, i32) {
    %c0_i32 = arith.constant 0 : i32
    %c0_i32_0 = arith.constant 0 : i32
    %c0_i32_1 = arith.constant 0 : i32
    return %arg0, %c0_i32, %c0_i32_0 : i32, i32, i32
  }
  func.func @transform_1(%arg0: i32, %arg1: i32) -> (i32, i32, i32) {
    %c0_i32 = arith.constant 0 : i32
    %c0_i32_0 = arith.constant 0 : i32
    %c0_i32_1 = arith.constant 0 : i32
    return %c0_i32, %arg1, %c0_i32_0 : i32, i32, i32
  }
  func.func @transform_2(%arg0: i32, %arg1: i32) -> (i32, i32) {
    %c0_i32 = arith.constant 0 : i32
    %c0_i32_0 = arith.constant 0 : i32
    %c0_i32_1 = arith.constant 0 : i32
    return %c0_i32, %c0_i32_0 : i32, i32
  }
  func.func @transform_3(%arg0: i32, %arg1: i32) -> (i32, i32, i32) {
    %c0_i32 = arith.constant 0 : i32
    %c0_i32_0 = arith.constant 0 : i32
    return %arg0, %arg1, %c0_i32 : i32, i32, i32
  }
}

</mosaic_0001>

<bundles_post_ra>
// kernel: block_forward.1
= control target key start
LH: loop header
LB: loop body
LE: loop exit
PB: predicated region body
PF: predicated region fallthrough
CT: control target
= control target key end

     0   :  { %8 = vsyncpa [#allocation3], 0  ;;  %s1313_s0 = inlined_call_operand.hbm [shape: bf16[2,32,256], index: 0, kind: input, shape index: {}]   ;;  %s1314_s1 = inlined_call_operand.hbm [shape: bf16[4,8,32], index: 1, kind: input, shape index: {}]   ;;  %s1315_s2 = inlined_call_operand.hbm [shape: f32[1,128], index: 2, kind: input, shape index: {}]   ;;  %s1316_s3 = inlined_call_operand.hbm [shape: f32[2,8,128], index: 3, kind: output, shape index: {}]  }
   0x1   :  { %10 = vsyncpa [#allocation3 + $0x1], 0 }
   0x2   :  { %11 = vsyncpa [#allocation6], 0 }
   0x3   :  { %12 = vsyncpa [#allocation4], 0 }
   0x4   :  { %14 = vsyncpa [#allocation4 + $0x1], 0  ;;  %s1026_s12 = smov 0   ;;  %s1028_s13 = smov 0  }
   0x5   :  { %s1030_s14 = smov 0   ;;  %s1032_s15 = smov 0  }
   0x6   :  { %s1034_s16 = smov 0   ;;  %s1036_s17 = smov 0  }
   0x7 LB: > { %s634_s18 = sadd.s32 4294967295, %s991_s17   ;;  %s635_s19 = sadd.s32 4294967294, %s991_s17   ;;  %s991_s17 = sphi %s1036_s17, %s20_s17   ;;  %s987_s16 = sphi %s1034_s16, %s1338_s16   ;;  %s983_s15 = sphi %s1032_s15, %s1337_s15   ;;  %s979_s14 = sphi %s1030_s14, %s1336_s14   ;;  %s975_s13 = sphi %s1028_s13, %s1335_s13   ;;  %s971_s12 = sphi %s1026_s12, %s1334_s12  }
   0x8   : > { %p52_p0 = scmp.ne.s32.totalorder %s975_s13, %s971_s12  ;;  %p1060_p1 = scmp.eq.s32.totalorder %s634_s18, 0 }
   0x9   : > { %p1064_p2 = scmp.eq.s32.totalorder %s634_s18, 1  ;;  %p131_p3 = scmp.eq.s32.totalorder %s635_s19, 1 }
   0xa   : > { %s1321_s20 = scalar_select %p1060_p1, 1, 0 }
   0xb   : > { %p1070_p4 = por %p1060_p1, %p52_p0  ;;  %p636_p5 = scmp.ge.s32.totalorder %s991_s17, 1 }
   0xc   : > { %p1075_p6 = por %p131_p3, %p52_p0  ;;  %p138_p7 = scmp.lt.s32.totalorder %s991_s17, 3 }
   0xd   : > { %s1323_s22 = scalar_select %p1070_p4, 1, 0 }
   0xe   : > { %s1324_s23 = scalar_select %p1075_p6, 1, 0 }
   0xf   : > { %p1080_p8 = pnand %p636_p5, %p138_p7  ;;  %s993_s25 = smov [#allocation5]  }
  0x10   : > { %s152_s26 = sshll.u32 %s993_s25, 4  ;;  %s994_s28 = smov [#allocation7]   ;;  %s1084_s26 = int_to_ptr.vmem [resolvable:$true] %s152_s26 }
  0x11   : > { %p729_p9 = pneg %p1080_p8  ;;  %s166_s29 = sshll.u32 %s994_s28, 4  ;;  %s1095_s29 = int_to_ptr.vmem [resolvable:$true] %s166_s29 }
  0x12   : > { %s819_s5 = scalar_lea.hbm %s1314_s1, 256 }
  0x13   : > { %p1091_p11 = pnand %p729_p9, %p1060_p1  ;;  %p820_p12 = scmp.ne.s32.totalorder %s1314_s1, %s819_s5 }
  0x14   : > { %p826_p5 = scmp.lt.u32.totalorder %s819_s5, %s1314_s1 }
  0x15   : > { %p821_p13 = pneg %p1091_p11 }
  0x17   : > { %p822_p0 = pnand %p821_p13, %p820_p12 }
  0x19   : > { %p823_p3 = pneg %p822_p0 }
  0x1b   : > { %p828_p7 = pnand %p826_p5, %p823_p3 }
  0x1d   : > { %831 = shalt.err (!%p828_p7)
}
  0x1e   : > { %s832_s10 = scalar_lea.vmem %s1084_s26, 256  ;;  %p840_p1 = scmp.lt.s32.totalorder %s1084_s26, %s1084_s26 }
  0x1f   : > { %p833_p9 = scmp.ne.s32.totalorder %s1084_s26, %s832_s10  ;;  %p841_p12 = scmp.lt.s32.totalorder %s832_s10, %s832_s10 }
  0x21   : > { %p835_p10 = pnand %p833_p9, %p821_p13  ;;  %p842_p0 = por %p841_p12, %p840_p1 }
  0x23   : > { %p836_p6 = pneg %p835_p10 }
  0x25   : > { %p843_p4 = pnand %p842_p0, %p836_p6 }
  0x27   : > { %846 = shalt.err (!%p843_p4)
}
  0x28   : > { %s995_s11 = smov 64   ;;  %s996_s18 = smov 4  }
  0x29   : > { %732 = dma.hbm_to_vmem [thread:$0]  (!%p1091_p11), %s1314_s1, 256, %s1084_s26, [#allocation6], %s995_s11, %s995_s11, %s996_s18  }
  0x2a   : > { %s847_s4 = scalar_lea.hbm %s1315_s2, 16 }
  0x2b   : > { %p848_p1 = scmp.ne.s32.totalorder %s1315_s2, %s847_s4  ;;  %p854_p10 = scmp.lt.u32.totalorder %s847_s4, %s1315_s2 }
  0x2d   : > { %p850_p4 = pnand %p848_p1, %p821_p13 }
  0x2f   : > { %p851_p6 = pneg %p850_p4 }
  0x31   : > { %p856_p3 = pnand %p854_p10, %p851_p6 }
  0x33   : > { %859 = shalt.err (!%p856_p3)
}
  0x34   : > { %s860_s26 = scalar_lea.vmem %s1095_s29, 16  ;;  %s867_s9 = scalar_lea.vmem %s1095_s29, 32 }
  0x35   : > { %p861_p5 = scmp.ne.s32.totalorder %s1095_s29, %s860_s26  ;;  %p868_p12 = scmp.lt.s32.totalorder %s1095_s29, %s1095_s29 }
  0x36   : > { %p869_p0 = scmp.lt.s32.totalorder %s867_s9, %s860_s26 }
  0x37   : > { %p863_p7 = pnand %p861_p5, %p821_p13 }
  0x38   : > { %p870_p1 = por %p869_p0, %p868_p12 }
  0x39   : > { %p864_p9 = pneg %p863_p7 }
  0x3b   : > { %p871_p4 = pnand %p870_p1, %p864_p9 }
  0x3d   : > { %874 = shalt.err (!%p871_p4)
}
  0x3e   : > { %735 = dma.hbm_to_vmem [thread:$0]  (!%p1091_p11), %s1315_s2, 16, %s1095_s29, [#allocation6]  }
  0x3f   : > { %s32_s18 = sadd.s32 1, %s987_s16  ;;  %s39_s19 = sadd.s32 1, %s979_s14 }
  0x40   : > { %p34_p13 = scmp.ge.s32.totalorder %s32_s18, 2  ;;  %p46_p6 = scmp.ne.s32.totalorder %s979_s14, %s975_s13 }
  0x41   : > { %p47_p10 = scmp.eq.s32.totalorder %s991_s17, 0  ;;  %p746_p3 = scmp.lt.s32.totalorder %s991_s17, 2 }
  0x42   : > { %s1340_s18 = smov (%p34_p13, %s32_s18), 0  ;;  %p1160_p7 = por %p1064_p2, %p46_p6 }
  0x43   : > { %p48_p5 = por %p47_p10, %p46_p6  ;;  %s36_s25 = ssub.s32 %s987_s16, %s1340_s18 }
  0x44   : > { %s1327_s27 = scalar_select %p1160_p7, 1, 0 }
  0x45   : > { %s177_s28 = sand.u32 1, %s979_s14   ;;  %p37_p9 = scmp.eq.s32.totalorder %s36_s25, 0 }
  0x46   : > { %s640_s29 = sshll.u32 %s177_s28, 5  ;;  %s663_s30 = sshll.u32 %s987_s16, 9 }
  0x47   : > { %s1169_s4 = scalar_select %p37_p9, %s979_s14, %s39_s19  }
  0x48   : > { %s1174_s7 = scalar_lea.hbm %s1313_s0, %s663_s30  ;;  %s181_s21 = scalar_lea.vmem [#allocation2], %s640_s29 }
  0x49   : > { %s188_s8 = sshll.u32 %s181_s21, 4  ;;  %p1178_p2 = pnand %p746_p3, %p48_p5  ;;  %s1182_s8 = int_to_ptr.vmem [resolvable:$true] %s188_s8 }
  0x4a   : > { %s1184_s9 = scalar_lea.sflag [#allocation3], %s177_s28  ;;  %s875_s10 = scalar_lea.hbm %s1174_s7, 512 }
  0x4b   : > { %p876_p11 = scmp.ne.s32.totalorder %s1174_s7, %s875_s10  ;;  %p877_p12 = pneg %p1178_p2 }
  0x4c   : > { %s880_s25 = scalar_lea.hbm %s1313_s0, 1024  ;;  %p881_p4 = scmp.lt.u32.totalorder %s1174_s7, %s1313_s0 }
  0x4d   : > { %p878_p0 = pnand %p877_p12, %p876_p11  ;;  %p882_p13 = scmp.lt.u32.totalorder %s880_s25, %s875_s10 }
  0x4e   : > { %p884_p10 = scmp.lt.u32.totalorder %s875_s10, %s1174_s7 }
  0x4f   : > { %p879_p1 = pneg %p878_p0  ;;  %p883_p6 = por %p882_p13, %p881_p4 }
  0x51   : > { %p885_p3 = por %p884_p10, %p883_p6 }
  0x53   : > { %p886_p5 = pnand %p885_p3, %p879_p1 }
  0x55   : > { %889 = shalt.err (!%p886_p5)
}
  0x56   : > { %s890_s28 = scalar_lea.vmem %s1182_s8, 512  ;;  %s997_s5 = smov [#allocation2]  }
  0x57   : > { %p891_p9 = scmp.ne.s32.totalorder %s1182_s8, %s890_s28  ;;  %s895_s6 = sshll.u32 %s997_s5, 4  ;;  %s896_s6 = int_to_ptr.vmem [resolvable:$false] %s895_s6 }
  0x58   : > { %s897_s21 = scalar_lea.vmem %s896_s6, 1024  ;;  %p898_p7 = scmp.lt.s32.totalorder %s1182_s8, %s896_s6 }
  0x59   : > { %p893_p11 = pnand %p891_p9, %p877_p12  ;;  %p899_p4 = scmp.lt.s32.totalorder %s897_s21, %s890_s28 }
  0x5b   : > { %p894_p0 = pneg %p893_p11  ;;  %p900_p13 = por %p899_p4, %p898_p7 }
  0x5d   : > { %p901_p6 = pnand %p900_p13, %p894_p0 }
  0x5f   : > { %904 = shalt.err (!%p901_p6)
}
  0x60   : > { %s998_s10 = smov 128   ;;  %s999_s11 = smov 8  }
  0x61   : > { %739 = dma.hbm_to_vmem [thread:$0]  (!%p1178_p2), %s1174_s7, 512, %s1182_s8, %s1184_s9, %s998_s10, %s998_s10, %s999_s11  }
  0x62   : > { %200 = sbr.rel (%p1080_p8) target bundleno = 654 (0x28e), region = 32  ;;  %s1215_s19 = sand.u32 (!%p1080_p8), 1, %s975_s13  }
  0x63   : > { %s644_s25 = sshll.u32 (!%p1080_p8), %s1215_s19, 5  ;;  %s203_s29 = scalar_lea.sflag (!%p1080_p8), [#allocation3], %s1215_s19 }
  0x64   : > { %s1219_s30 = scalar_lea.vmem (!%p1080_p8), [#allocation2], %s644_s25  ;;  %p1329_p7 = scmp.ne.s32.totalorder (!%p1080_p8), %s1323_s22, 0 }
  0x69   : > { %958 = dma.done.wait (%p1329_p7), %s203_s29, 512  }
  0x6a   : > { %960 = vsyncadd (%p1329_p7), %s203_s29, 4294966784  ;;  %p1330_p2 = scmp.ne.s32.totalorder %s1321_s20, 0 }
  0x6c   : > { %962 = dma.done.wait (%p1330_p2), [#allocation6], 272  }
  0x6d   : > { %964 = vsyncadd (%p1330_p2), [#allocation6], 4294967024  ;;  %v1000_v0 = vmov 0.0   ;;  %vm1001_vm0 = vmmov 0   ;;  %v809_v1 = vld [vmem:[%s1219_s30] ss:$8 sps:$4 sm:$0xff]  }
  0x6e   : > { %676 = vmatprep.subr.bf16.mxu1 %v1000_v0  ;;  %692 = vmatprep.subr.bf16.mxu0 %v1000_v0  ;;  %s1002_s22 = smov 118   ;;  %s1003_s20 = smov 119   ;;  %v811_v2 = vld [vmem:[%s1219_s30 + $0x4] ss:$8 sps:$4 sm:$0xff]   ;;  %v812_v3 = vld [vmem:[%s1219_s30 + $0x14] ss:$8 sps:$4 sm:$0xff]  }
  0x6f   : > { %680 = vmatprep.mubr.msk.bf16.mxu1 %vm1001_vm0, %v1000_v0  ;;  %696 = vmatprep.mubr.msk.bf16.mxu0 %vm1001_vm0, %v1000_v0  ;;  %v814_v4 = vld [vmem:[%s1219_s30 + $0x10] ss:$8 sps:$4 sm:$0xff]   ;;  %s1004_s24 = smov 127   ;;  %vm275_vm1 = vcmask 973824   ;;  %vm389_vm2 = vcmask 965632   ;;  %vm280_vm3 = vcmask 261120  }
  0x70   : > { %381 = vrot.lane.b32.xlu1 %v809_v1, %s1002_s22  ;;  %267 = vrot.lane.b32.xlu0 %v809_v1, %s1003_s20  ;;  %v250_v14 = vld [vmem:[#allocation5 + $0x8] sm:$0xf]  ;;  %vm445_vm4 = vcmask 1039360   ;;  %v380_v19 = vld [vmem:[#allocation5 + $0xc] sm:$0xf]  ;;  %s647_s7 = sshll.u32 %s1215_s19, 3 }
  0x71   : > { %v815_v15 = vld [vmem:[%s1219_s30] ss:$8 sps:$4 sm:$0xff]   ;;  %v816_v20 = vld [vmem:[%s1219_s30 + $0x10] ss:$8 sps:$4 sm:$0xff]   ;;  %v248_v28 = vld [vmem:[#allocation5 + $0x4] sm:$0xf] }
  0x72   : > { %v242_v27 = vld [vmem:[#allocation5] sm:$0xf]  ;;  %v658_v34 = vld [vmem:[#allocation7] ss:$0 sm:$0xff]  ;;  %s660_s8 = sshll.u32 %s983_s15, 7  ;;  %s236_s26 = scalar_lea.vmem [#allocation8], %s647_s7 }
  0x73   : > { %s534_s9 = sshll.u32 %s236_s26, 4  ;;  %s1264_s6 = scalar_lea.hbm %s1316_s3, %s660_s8  ;;  %s1266_s9 = int_to_ptr.vmem [resolvable:$true] %s534_s9 }
  0x74   : > { %383 = vrot.lane.b32.xlu1 %v811_v2, %s1002_s22  ;;  %269 = vrot.lane.b32.xlu0 %v811_v2, %s1003_s20  ;;  %s520_s21 = scalar_lea.sflag [#allocation4], %s1215_s19  ;;  %s905_s10 = scalar_lea.vmem %s1266_s9, 128 }
  0x75   : > { %p906_p8 = scmp.ne.s32.totalorder %s1266_s9, %s905_s10  ;;  %p1331_p12 = scmp.ne.s32.totalorder %s1327_s27, 0 }
  0x76   : > { %s1005_s15 = smov [#allocation8]  }
  0x77   : > { %p907_p1 = pnand %p906_p8, %p1331_p12  ;;  %s909_s11 = sshll.u32 %s1005_s15, 4  ;;  %s910_s11 = int_to_ptr.vmem [resolvable:$false] %s909_s11 }
  0x78   : > { %273 = vrot.lane.b32.xlu1 %v812_v3, %s1003_s20  ;;  %271 = vrot.lane.b32.xlu0 %v814_v4, %s1003_s20  ;;  %s911_s25 = scalar_lea.vmem %s910_s11, 256  ;;  %p912_p3 = scmp.lt.s32.totalorder %s1266_s9, %s910_s11 }
  0x79   : > { %p908_p10 = pneg %p907_p1  ;;  %p913_p5 = scmp.lt.s32.totalorder %s911_s25, %s905_s10 }
  0x7b   : > { %p914_p9 = por %p913_p5, %p912_p3 }
  0x7c   : > { %387 = vrot.lane.b32.xlu1 %v812_v3, %s1002_s22  ;;  %385 = vrot.lane.b32.xlu0 %v814_v4, %s1002_s22 }
  0x7d   : > { %p915_p11 = pnand %p914_p9, %p908_p10 }
  0x80   : > { %439 = vrot.lane.b32.xlu1 %v811_v2, %s1004_s24  ;;  %437 = vrot.lane.b32.xlu0 %v809_v1, %s1004_s24 }
  0x84   : > { %443 = vrot.lane.b32.xlu1 %v812_v3, %s1004_s24  ;;  %441 = vrot.lane.b32.xlu0 %v814_v4, %s1004_s24 }
  0xe2   : > { %v382_v5 = vpop.permute.xlu1 %381  ;;  %v268_v6 = vpop.permute.xlu0 %267 }
  0xe6   : > { %v384_v7 = vpop.permute.xlu1 %383  ;;  %v270_v8 = vpop.permute.xlu0 %269 }
  0xe7   : > { %v276_v9 = vsel %vm275_vm1, %v268_v6, %v270_v8  ;;  %v390_v10 = vsel %vm389_vm2, %v382_v5, %v384_v7 }
  0xe8   : > { %677 = vmatpush3.bf16.msra.mxu1 %v276_v9  ;;  %693 = vmatpush3.bf16.msra.mxu0 %v390_v10 }
  0xe9   : > { %678 = vmatprep.subr.bf16.mxu1 %v1000_v0  ;;  %694 = vmatprep.subr.bf16.mxu0 %v1000_v0 }
  0xea   : > { %v274_v11 = vpop.permute.xlu1 %273  ;;  %v272_v12 = vpop.permute.xlu0 %271 }
  0xeb   : > { %v277_v13 = vsel %vm275_vm1, %v272_v12, %v274_v11 }
  0xec   : > { %679 = vmatpush3.bf16.msra.mxu1 %v277_v13 }
  0xed   : > { %684 = vmatprep.subr.bf16.mxu1 %v1000_v0 }
  0xee   : > { %v388_v16 = vpop.permute.xlu1 %387  ;;  %v386_v17 = vpop.permute.xlu0 %385 }
  0xef   : > { %681 = vmatmul.mubr.msk.bf16.vlgmr.msra.gmra.mrb[0].mxu1 %vm280_vm3, %v250_v14  ;;  %v391_v18 = vsel %vm389_vm2, %v386_v17, %v388_v16 }
  0xf0   : > { %695 = vmatpush3.bf16.msra.mxu0 %v391_v18  ;;  %685 = vmatpush3.bf16.msra.mxu1 %v815_v15 }
  0xf1   : > { %700 = vmatprep.subr.bf16.mxu0 %v1000_v0  ;;  %686 = vmatprep.subr.bf16.mxu1 %v1000_v0 }
  0xf2   : > { %v440_v21 = vpop.permute.xlu1 %439  ;;  %v438_v22 = vpop.permute.xlu0 %437  ;;  %688 = vmatprep.mubr.msk.bf16.mxu1 %vm1001_vm0, %v1000_v0 }
  0xf3   : > { %v446_v23 = vsel %vm445_vm4, %v438_v22, %v440_v21  ;;  %697 = vmatmul.mubr.msk.bf16.vlgmr.msra.gmra.mrb[0].mxu0 %vm280_vm3, %v380_v19 }
  0xf4   : > { %701 = vmatpush3.bf16.msra.mxu0 %v446_v23  ;;  %687 = vmatpush3.bf16.msra.mxu1 %v816_v20 }
  0xf5   : > { %702 = vmatprep.subr.bf16.mxu0 %v1000_v0  ;;  %704 = vmatprep.mubr.msk.bf16.mxu0 %vm1001_vm0, %v1000_v0 }
  0xf6   : > { %v444_v24 = vpop.permute.xlu1 %443  ;;  %v442_v25 = vpop.permute.xlu0 %441 }
  0xf7   : > { %v447_v26 = vsel %vm445_vm4, %v442_v25, %v444_v24 }
  0xf8   : > { %703 = vmatpush3.bf16.msra.mxu0 %v447_v26 }
  0xfb   : > { %689 = vmatmul.mubr.msk.bf16.vlgmr.msra.gmra.mrb[0].mxu1 %vm280_vm3, %v242_v27 }
  0xff   : > { %705 = vmatmul.mubr.msk.bf16.vlgmr.msra.gmra.mrb[0].mxu0 %vm280_vm3, %v248_v28 }
 0x1ce   : > { %v373_v29 = vpop.f32.mrb[0].mxu1 }
 0x1cf   : > { %v690_v30 = vpop.f32.mrb[1].mxu1 }
 0x1d0   : > { %v376_v31 = vpop.f32.mrb[2].mxu1 }
 0x1d1   : > { %v691_v32 = vpop.f32.mrb[3].mxu1 }
 0x1d2   : > { %v487_v33 = vpop.f32.mrb[0].mxu0 }
 0x1d3   : > { %v708_v35 = vadd.f32 %v487_v33, %v373_v29  ;;  %v706_v36 = vpop.f32.mrb[1].mxu0 }
 0x1d4   : > { %v490_v37 = vpop.f32.mrb[2].mxu0 }
 0x1d5   : > { %v707_v38 = vpop.f32.mrb[3].mxu0  ;;  %v501_v39 = vmul.f32 %v708_v35, %v658_v34 }
 0x1d7   : > { %502 = vadd.xlane.f32.xlu0 %v501_v39  ;;  %v504_v40 = vmul.f32 %v708_v35, %v501_v39 }
 0x1d9   : > { %505 = vadd.xlane.f32.xlu1 %v504_v40 }
 0x264   : > { %v503_v41 = vpop.xlane.xlu0 %502 }
 0x265   : > { %v507_v42 = vmul.f32 0.015625, %v503_v41 }
 0x266   : > { %v506_v43 = vpop.xlane.xlu1 %505 }
 0x267   : > { %v509_v44 = vmul.f32 %v507_v42, %v507_v42  ;;  %v508_v45 = vmul.f32 0.015625, %v506_v43  ;;  %v512_v49 = vsub.f32 %v708_v35, %v507_v42 }
 0x269   : > { %v510_v46 = vsub.f32 %v508_v45, %v509_v44 }
 0x26b   : > { %v511_v47 = vmax.f32 %v510_v46, 0.0 }
 0x26d   : > { %v513_v48 = vadd.f32 1e-05, %v511_v47 }
 0x26f   : > { %817 = vrsqrt.f32 %v513_v48 }
 0x279   : > { %v818_v50 = vpop.eup %817 }
 0x27a   : > { %v515_v51 = vmul.f32 %v818_v50, %v512_v49 }
 0x27c   : > { %v516_v52 = vmul.f32 0.2, %v515_v51 }
 0x27e   : > { %v517_v53 = vmax.f32 %v515_v51, %v516_v52 }
 0x280   : > { %518 = vst [vmem:[%s236_s26] sm:$0xff] %v517_v53 }
 0x281   : > { %918 = shalt.err (!%p915_p11)
}
 0x282   : > { %s919_s19 = scalar_lea.hbm %s1264_s6, 128  ;;  %s923_s22 = scalar_lea.hbm %s1316_s3, 256 }
 0x283   : > { %p920_p0 = scmp.ne.s32.totalorder %s1264_s6, %s919_s19  ;;  %p924_p6 = scmp.lt.u32.totalorder %s1264_s6, %s1316_s3 }
 0x284   : > { %p925_p7 = scmp.lt.u32.totalorder %s923_s22, %s919_s19  ;;  %p927_p8 = scmp.lt.u32.totalorder %s919_s19, %s1264_s6 }
 0x285   : > { %p921_p4 = pnand %p920_p0, %p1331_p12 }
 0x286   : > { %p926_p2 = por %p925_p7, %p924_p6 }
 0x287   : > { %p922_p13 = pneg %p921_p4 }
 0x288   : > { %p928_p1 = por %p927_p8, %p926_p2 }
 0x28a   : > { %p929_p10 = pnand %p928_p1, %p922_p13 }
 0x28c   : > { %932 = shalt.err (!%p929_p10)
}
 0x28d   : > { %727 = dma.vmem_to_hbm [thread:$0]  (%p1331_p12), %s1266_s9, 128, %s1264_s6, %s520_s21  }
 0x28e PF: > { %s546_s7 = sand.u32 1, %s971_s12   ;;  %p1332_p3 = scmp.ne.s32.totalorder %s1324_s23, 0 }
 0x28f   : > { %p1333_p5 = scmp.ge.s32.totalorder %s991_s17, 2  ;;  %s547_s8 = scalar_lea.sflag [#allocation4], %s546_s7 }
 0x291   : > { %p741_p9 = pnand %p1333_p5, %p1332_p3 }
 0x293   : > { %966 = dma.done.wait (!%p741_p9), %s547_s8, 128  }
 0x294   : > { %968 = vsyncadd (!%p741_p9), %s547_s8, 4294967168  ;;  %s20_s17 = sadd.s32 1, %s991_s17   ;;  %s1334_s12 = smov %s975_s13 }
 0x295   : > { %p17_p11 = scmp.ge.s32.totalorder %s20_s17, 4   ;;  %s1335_s13 = smov %s979_s14 }
 0x296   : > { %s1336_s14 = smov %s1169_s4  ;;  %s1337_s15 = smov %s987_s16 }
 0x297   : > { %s1338_s16 = smov %s1340_s18  ;;  %19 = sbr.rel (!%p17_p11) target bundleno = 7 (0x7), region = 89 }
 0x29e   :  { %552 = vsyncpa [#allocation3], 1 }
 0x29f   :  { %554 = vsyncpa [#allocation3 + $0x1], 1 }
 0x2a0   :  { %555 = vsyncpa [#allocation6], 1 }
 0x2a1   :  { %556 = vsyncpa [#allocation4], 1 }
 0x2a2   :  { %558 = vsyncpa [#allocation4 + $0x1], 1 }

</bundles_post_ra>
